<compile_context>
chip_gen: v5e
topology: v5e:2x2
jax: 0.10.0
libtpu: 0.0.40
codegen_flags: <defaults>
</compile_context>

<pallas_src>
import functools

import jax
import jax.numpy as jnp
import numpy as np
from jax import lax
from jax.experimental import pallas as pl
from jax.experimental.pallas import tpu as pltpu

_LANE = 128


def _round_up(n, m=_LANE):
    return ((n + m - 1) // m) * m


def _pad2(a, rows, cols):
    """Zero-pad a 2-D array up to (rows, cols)."""
    r, c = a.shape
    return jnp.pad(a, ((0, rows - r), (0, cols - c)))


# ----------------------------------------------------------------------------
# Pallas kernel: full GraphER forward (GIN layers + edge features + predictor)
# ----------------------------------------------------------------------------
def _grapher_kernel(num_layer, *refs):
    it = iter(refs)
    scal_ref = next(it)        # SMEM (2,): [t, bp2]
    x_ref = next(it)           # (N, Cp)
    adj_ref = next(it)         # (N, N)   adj[i, j] = #edges j -> i
    gin = [(next(it), next(it), next(it), next(it)) for _ in range(num_layer)]
    selu_ref = next(it)        # (C+1, N) one-hot u: row0 = first edge, rows 1.. = cands
    selv_ref = next(it)        # (C+1, N) one-hot v
    wt1_ref, bt1_ref, wt2_ref, bt2_ref = next(it), next(it), next(it), next(it)
    wffs_ref, wffa_ref, wefs_ref, wefa_ref, wte_ref = (next(it) for _ in range(5))
    bp1_ref = next(it)         # (1, Hp)
    wp2t_ref = next(it)        # (1, Hp)  (wp2 transposed)
    out_ref = next(it)         # (1, C)   lane-dense logits

    f32 = jnp.float32
    h = x_ref[...]
    adj = adj_ref[...]

    # GINConv (eps = 0): h <- MLP(h + sum_{j in N(i)} h_j); neighbor sum = adj @ h
    for (w1_ref, b1_ref, w2_ref, b2_ref) in gin:
        z = h + jnp.dot(adj, h, preferred_element_type=f32)
        z = jnp.maximum(
            jnp.dot(z, w1_ref[...], preferred_element_type=f32) + b1_ref[...], 0.0)
        h = jnp.dot(z, w2_ref[...], preferred_element_type=f32) + b2_ref[...]

    # One fused one-hot gather for the first edge (row 0) and all candidates.
    xu = jnp.dot(selu_ref[...], h, preferred_element_type=f32)   # (C+1, Hp)
    xv = jnp.dot(selv_ref[...], h, preferred_element_type=f32)   # (C+1, Hp)
    xs = xu + xv
    xa = jnp.abs(xu - xv)

    # time embedding: Linear(1, H) applied to a scalar is t * w_row + b.
    tval = scal_ref[0]
    te = jnp.maximum(tval * wt1_ref[...] + bt1_ref[...], 0.0)     # (1, Hp)
    te = jnp.dot(te, wt2_ref[...], preferred_element_type=f32) + bt2_ref[...]

    # Predictor first layer with wp1 split by input segment:
    #   feat = [ff_sum | ff_abs | ef_sum | ef_abs | te] ; feat @ wp1 + bp1
    # The first-edge / time / bias terms are identical for every candidate, so
    # fold them into a single (1, Hp) row instead of broadcasting a (C, 5H) feat.
    bias_row = (jnp.dot(xs[0:1], wffs_ref[...], preferred_element_type=f32)
                + jnp.dot(xa[0:1], wffa_ref[...], preferred_element_type=f32)
                + jnp.dot(te, wte_ref[...], preferred_element_type=f32)
                + bp1_ref[...])                                   # (1, Hp)

    s = jnp.maximum(
        jnp.dot(xs[1:], wefs_ref[...], preferred_element_type=f32)
        + jnp.dot(xa[1:], wefa_ref[...], preferred_element_type=f32)
        + bias_row, 0.0)                                          # (C, Hp)

    # Final Linear(H, 1), emitted lane-dense as (1, C): contract the Hp axis of
    # s against the transposed wp2 row (rhs-transposed matmul, q@k.T pattern).
    scores = lax.dot_general(wp2t_ref[...], s,
                             dimension_numbers=(((1,), (1,)), ((), ())),
                             preferred_element_type=f32)          # (1, C)
    out_ref[...] = scores + scal_ref[1]


# ----------------------------------------------------------------------------
# Wrapper: builds dense adjacency / fused one-hot selectors, pads to lane width,
# splits the predictor weight, and calls the kernel.
# ----------------------------------------------------------------------------
def grapher_forward(params, x, edge_index, first_edge, candidate_edges, t):
    f32 = jnp.float32
    N, c_in = x.shape
    num_layer = len(params["gin"])
    H = params["gin"][0][2].shape[0]            # hidden dim (w2 is (H, H))
    Hp = _round_up(H)
    Cp_in = _round_up(c_in)
    C = candidate_edges.shape[0]

    # dense adjacency: adj[i, j] = #directed edges j -> i   (small-N only)
    src, dst = edge_index[0], edge_index[1]
    adj = jnp.zeros((N, N), f32).at[dst, src].add(1.0)

    # fused one-hot selectors: row 0 = first_edge, rows 1..C = candidate edges
    u_idx = jnp.concatenate([jnp.asarray([first_edge[0]], jnp.int32),
                             candidate_edges[:, 0].astype(jnp.int32)])
    v_idx = jnp.concatenate([jnp.asarray([first_edge[1]], jnp.int32),
                             candidate_edges[:, 1].astype(jnp.int32)])
    sel_u = jax.nn.one_hot(u_idx, N, dtype=f32)
    sel_v = jax.nn.one_hot(v_idx, N, dtype=f32)

    wp1, bp1, wp2, bp2 = params["pred"]
    scalars = jnp.concatenate(
        [jnp.asarray([t], f32), bp2.reshape(-1)[:1].astype(f32)])   # SMEM [t, bp2]

    inputs = [scalars, _pad2(x.astype(f32), N, Cp_in), adj]
    fin_p = Cp_in
    for (w1, b1, w2, b2) in params["gin"]:
        inputs += [_pad2(w1, fin_p, Hp), _pad2(b1.reshape(1, -1), 1, Hp),
                   _pad2(w2, Hp, Hp), _pad2(b2.reshape(1, -1), 1, Hp)]
        fin_p = Hp
    inputs += [sel_u, sel_v]

    wt1, bt1, wt2, bt2 = params["time"]
    inputs += [_pad2(wt1.reshape(1, -1), 1, Hp), _pad2(bt1.reshape(1, -1), 1, Hp),
               _pad2(wt2, Hp, Hp), _pad2(bt2.reshape(1, -1), 1, Hp)]

    # split wp1 (5H, H) into its [ff_sum | ff_abs | ef_sum | ef_abs | te] blocks
    inputs += [_pad2(wp1[0 * H:1 * H], Hp, Hp), _pad2(wp1[1 * H:2 * H], Hp, Hp),
               _pad2(wp1[2 * H:3 * H], Hp, Hp), _pad2(wp1[3 * H:4 * H], Hp, Hp),
               _pad2(wp1[4 * H:5 * H], Hp, Hp),
               _pad2(bp1.reshape(1, -1), 1, Hp),
               _pad2(wp2.reshape(1, -1), 1, Hp)]   # wp2 (H,1) -> row (1,H)

    # advisory cost estimate
    flops = 0
    fin = Cp_in
    for _ in range(num_layer):
        flops += 2 * N * N * fin + 2 * N * fin * Hp + 2 * N * Hp * Hp
        fin = Hp
    flops += 2 * 2 * (C + 1) * N * Hp          # endpoint gathers
    flops += 2 * Hp * Hp                       # time MLP 2nd linear
    flops += 2 * 3 * Hp * Hp                   # bias_row matmuls
    flops += 2 * 2 * C * Hp * Hp               # per-candidate matmuls
    flops += 2 * C * Hp                        # final contraction
    bytes_accessed = sum(int(a.size) * 4 for a in inputs) + C * 4
    cost = pl.CostEstimate(flops=int(flops), transcendentals=0,
                           bytes_accessed=int(bytes_accessed))

    in_specs = ([pl.BlockSpec(memory_space=pltpu.MemorySpace.SMEM)]
                + [pl.BlockSpec(memory_space=pltpu.MemorySpace.VMEM)]
                * (len(inputs) - 1))

    out = pl.pallas_call(
        functools.partial(_grapher_kernel, num_layer),
        out_shape=jax.ShapeDtypeStruct((1, C), f32),
        in_specs=in_specs,
        out_specs=pl.BlockSpec(memory_space=pltpu.MemorySpace.VMEM),
        cost_estimate=cost,
    )(*inputs)
    return out[0, :]   # logits, shape (C,)


# ----------------------------------------------------------------------------
# Pure-JAX reference (mirrors the PyTorch forward) for correctness checking
# ----------------------------------------------------------------------------
def grapher_reference(params, x, edge_index, first_edge, candidate_edges, t):
    N = x.shape[0]
    adj = jnp.zeros((N, N), jnp.float32).at[edge_index[1], edge_index[0]].add(1.0)
    h = x.astype(jnp.float32)
    for (w1, b1, w2, b2) in params["gin"]:
        z = h + adj @ h
        h = jnp.maximum(z @ w1 + b1, 0.0) @ w2 + b2

    def erep(u, v):
        xu, xv = h[u], h[v]
        return jnp.concatenate([xu + xv, jnp.abs(xu - xv)], axis=-1)

    ff = erep(first_edge[0], first_edge[1])
    wt1, bt1, wt2, bt2 = params["time"]
    te = jnp.maximum(jnp.float32(t) * wt1.reshape(-1) + bt1, 0.0) @ wt2 + bt2
    wp1, bp1, wp2, bp2 = params["pred"]
    scores = []
    for i in range(candidate_edges.shape[0]):
        ef = erep(candidate_edges[i, 0], candidate_edges[i, 1])
        feat = jnp.concatenate([ff, ef, te], axis=-1)
        s = jnp.maximum(feat @ wp1 + bp1, 0.0) @ wp2 + bp2
        scores.append(s)
    return jnp.concatenate(scores)


# ----------------------------------------------------------------------------
# Deterministic parameter init
# ----------------------------------------------------------------------------
def _init_linear(key, fin, fout, scale=0.1):
    k1, k2 = jax.random.split(key)
    w = jax.random.normal(k1, (fin, fout), jnp.float32) * scale
    b = jax.random.normal(k2, (fout,), jnp.float32) * scale
    return w, b


def init_grapher_params(key, in_channels, hidden_dim, num_layer):
    keys = jax.random.split(key, 4 * num_layer + 8)
    ki = iter(range(len(keys)))
    gin = []
    for i in range(num_layer):
        fin = in_channels if i == 0 else hidden_dim
        w1, b1 = _init_linear(keys[next(ki)], fin, hidden_dim)
        w2, b2 = _init_linear(keys[next(ki)], hidden_dim, hidden_dim)
        gin.append((w1, b1, w2, b2))
    wt1, bt1 = _init_linear(keys[next(ki)], 1, hidden_dim)
    wt2, bt2 = _init_linear(keys[next(ki)], hidden_dim, hidden_dim)
    wp1, bp1 = _init_linear(keys[next(ki)], hidden_dim * 4 + hidden_dim, hidden_dim)
    wp2, bp2 = _init_linear(keys[next(ki)], hidden_dim, 1)
    return {"gin": gin, "time": (wt1, bt1, wt2, bt2), "pred": (wp1, bp1, wp2, bp2)}


if __name__ == "__main__":
    key = jax.random.PRNGKey(0)
    N, C_IN, HIDDEN, NUM_LAYER = 16, 8, 32, 2

    kx, kp = jax.random.split(key)
    x = jax.random.normal(kx, (N, C_IN), jnp.float32)

    # undirected ring graph, stored as directed edges both ways (PyG convention)
    src = jnp.arange(N, dtype=jnp.int32)
    dst = (src + 1) % N
    edge_index = jnp.stack(
        [jnp.concatenate([src, dst]), jnp.concatenate([dst, src])])  # (2, 32)

    first_edge = (0, 1)
    candidate_edges = jnp.array(
        [[2, 3], [4, 5], [6, 7], [8, 9], [10, 11], [12, 13], [14, 15], [3, 6]],
        dtype=jnp.int32)  # (8, 2)
    t = 3.0

    params = init_grapher_params(kp, C_IN, HIDDEN, NUM_LAYER)

    logits = grapher_forward(params, x, edge_index, first_edge, candidate_edges, t)
    logits = jax.block_until_ready(logits)

    ref = grapher_reference(params, x, edge_index, first_edge, candidate_edges, t)
    np.testing.assert_allclose(np.asarray(logits), np.asarray(ref),
                               rtol=1e-4, atol=1e-4)
    print("KERNEL_OK")
</pallas_src>

<mosaic_0001>
module attributes {stable_mosaic.version = 11 : i64} {
  func.func @_grapher_kernel(%arg0: memref<2xf32, #tpu.memory_space<smem>>, %arg1: memref<16x128xf32, #tpu.memory_space<vmem>>, %arg2: memref<16x16xf32, #tpu.memory_space<vmem>>, %arg3: memref<128x128xf32, #tpu.memory_space<vmem>>, %arg4: memref<1x128xf32, #tpu.memory_space<vmem>>, %arg5: memref<128x128xf32, #tpu.memory_space<vmem>>, %arg6: memref<1x128xf32, #tpu.memory_space<vmem>>, %arg7: memref<128x128xf32, #tpu.memory_space<vmem>>, %arg8: memref<1x128xf32, #tpu.memory_space<vmem>>, %arg9: memref<128x128xf32, #tpu.memory_space<vmem>>, %arg10: memref<1x128xf32, #tpu.memory_space<vmem>>, %arg11: memref<9x16xf32, #tpu.memory_space<vmem>>, %arg12: memref<9x16xf32, #tpu.memory_space<vmem>>, %arg13: memref<1x128xf32, #tpu.memory_space<vmem>>, %arg14: memref<1x128xf32, #tpu.memory_space<vmem>>, %arg15: memref<128x128xf32, #tpu.memory_space<vmem>>, %arg16: memref<1x128xf32, #tpu.memory_space<vmem>>, %arg17: memref<128x128xf32, #tpu.memory_space<vmem>>, %arg18: memref<128x128xf32, #tpu.memory_space<vmem>>, %arg19: memref<128x128xf32, #tpu.memory_space<vmem>>, %arg20: memref<128x128xf32, #tpu.memory_space<vmem>>, %arg21: memref<128x128xf32, #tpu.memory_space<vmem>>, %arg22: memref<1x128xf32, #tpu.memory_space<vmem>>, %arg23: memref<1x128xf32, #tpu.memory_space<vmem>>, %arg24: memref<1x8xf32, #tpu.memory_space<vmem>>) attributes {dimension_semantics = [], scalar_prefetch = 0 : i64, scratch_operands = 0 : i64, tpu.core_type = #tpu.core_type<tc>} {
    %c0 = arith.constant 0 : index
    %c0_0 = arith.constant 0 : index
    %0 = vector.load %arg1[%c0, %c0_0] : memref<16x128xf32, #tpu.memory_space<vmem>>, vector<16x128xf32>
    %c0_1 = arith.constant 0 : index
    %c0_2 = arith.constant 0 : index
    %1 = vector.load %arg2[%c0_1, %c0_2] : memref<16x16xf32, #tpu.memory_space<vmem>>, vector<16x16xf32>
    %cst = arith.constant dense<0.000000e+00> : vector<16x128xf32>
    %2 = tpu.matmul %1, %0, %cst {dimension_numbers = #tpu.dot_dimension_numbers<[1], [0], [0], [1], [0, 0, 1, 1], [], []>} : vector<16x16xf32>, vector<16x128xf32>, vector<16x128xf32> -> vector<16x128xf32>
    %3 = arith.addf %0, %2 : vector<16x128xf32>
    %c0_3 = arith.constant 0 : index
    %c0_4 = arith.constant 0 : index
    %4 = vector.load %arg3[%c0_3, %c0_4] : memref<128x128xf32, #tpu.memory_space<vmem>>, vector<128x128xf32>
    %cst_5 = arith.constant dense<0.000000e+00> : vector<16x128xf32>
    %5 = tpu.matmul %3, %4, %cst_5 {dimension_numbers = #tpu.dot_dimension_numbers<[1], [0], [0], [1], [0, 0, 1, 1], [], []>} : vector<16x128xf32>, vector<128x128xf32>, vector<16x128xf32> -> vector<16x128xf32>
    %c0_6 = arith.constant 0 : index
    %c0_7 = arith.constant 0 : index
    %6 = vector.load %arg4[%c0_6, %c0_7] : memref<1x128xf32, #tpu.memory_space<vmem>>, vector<1x128xf32>
    %7 = vector.broadcast %6 : vector<1x128xf32> to vector<16x128xf32>
    %8 = arith.addf %5, %7 : vector<16x128xf32>
    %cst_8 = arith.constant 0.000000e+00 : f32
    %9 = vector.broadcast %cst_8 : f32 to vector<16x128xf32>
    %10 = arith.maximumf %8, %9 : vector<16x128xf32>
    %c0_9 = arith.constant 0 : index
    %c0_10 = arith.constant 0 : index
    %11 = vector.load %arg5[%c0_9, %c0_10] : memref<128x128xf32, #tpu.memory_space<vmem>>, vector<128x128xf32>
    %cst_11 = arith.constant dense<0.000000e+00> : vector<16x128xf32>
    %12 = tpu.matmul %10, %11, %cst_11 {dimension_numbers = #tpu.dot_dimension_numbers<[1], [0], [0], [1], [0, 0, 1, 1], [], []>} : vector<16x128xf32>, vector<128x128xf32>, vector<16x128xf32> -> vector<16x128xf32>
    %c0_12 = arith.constant 0 : index
    %c0_13 = arith.constant 0 : index
    %13 = vector.load %arg6[%c0_12, %c0_13] : memref<1x128xf32, #tpu.memory_space<vmem>>, vector<1x128xf32>
    %14 = vector.broadcast %13 : vector<1x128xf32> to vector<16x128xf32>
    %15 = arith.addf %12, %14 : vector<16x128xf32>
    %cst_14 = arith.constant dense<0.000000e+00> : vector<16x128xf32>
    %16 = tpu.matmul %1, %15, %cst_14 {dimension_numbers = #tpu.dot_dimension_numbers<[1], [0], [0], [1], [0, 0, 1, 1], [], []>} : vector<16x16xf32>, vector<16x128xf32>, vector<16x128xf32> -> vector<16x128xf32>
    %17 = arith.addf %15, %16 : vector<16x128xf32>
    %c0_15 = arith.constant 0 : index
    %c0_16 = arith.constant 0 : index
    %18 = vector.load %arg7[%c0_15, %c0_16] : memref<128x128xf32, #tpu.memory_space<vmem>>, vector<128x128xf32>
    %cst_17 = arith.constant dense<0.000000e+00> : vector<16x128xf32>
    %19 = tpu.matmul %17, %18, %cst_17 {dimension_numbers = #tpu.dot_dimension_numbers<[1], [0], [0], [1], [0, 0, 1, 1], [], []>} : vector<16x128xf32>, vector<128x128xf32>, vector<16x128xf32> -> vector<16x128xf32>
    %c0_18 = arith.constant 0 : index
    %c0_19 = arith.constant 0 : index
    %20 = vector.load %arg8[%c0_18, %c0_19] : memref<1x128xf32, #tpu.memory_space<vmem>>, vector<1x128xf32>
    %21 = vector.broadcast %20 : vector<1x128xf32> to vector<16x128xf32>
    %22 = arith.addf %19, %21 : vector<16x128xf32>
    %cst_20 = arith.constant 0.000000e+00 : f32
    %23 = vector.broadcast %cst_20 : f32 to vector<16x128xf32>
    %24 = arith.maximumf %22, %23 : vector<16x128xf32>
    %c0_21 = arith.constant 0 : index
    %c0_22 = arith.constant 0 : index
    %25 = vector.load %arg9[%c0_21, %c0_22] : memref<128x128xf32, #tpu.memory_space<vmem>>, vector<128x128xf32>
    %cst_23 = arith.constant dense<0.000000e+00> : vector<16x128xf32>
    %26 = tpu.matmul %24, %25, %cst_23 {dimension_numbers = #tpu.dot_dimension_numbers<[1], [0], [0], [1], [0, 0, 1, 1], [], []>} : vector<16x128xf32>, vector<128x128xf32>, vector<16x128xf32> -> vector<16x128xf32>
    %c0_24 = arith.constant 0 : index
    %c0_25 = arith.constant 0 : index
    %27 = vector.load %arg10[%c0_24, %c0_25] : memref<1x128xf32, #tpu.memory_space<vmem>>, vector<1x128xf32>
    %28 = vector.broadcast %27 : vector<1x128xf32> to vector<16x128xf32>
    %29 = arith.addf %26, %28 : vector<16x128xf32>
    %c0_26 = arith.constant 0 : index
    %c0_27 = arith.constant 0 : index
    %30 = vector.load %arg11[%c0_26, %c0_27] : memref<9x16xf32, #tpu.memory_space<vmem>>, vector<9x16xf32>
    %cst_28 = arith.constant dense<0.000000e+00> : vector<9x128xf32>
    %31 = tpu.matmul %30, %29, %cst_28 {dimension_numbers = #tpu.dot_dimension_numbers<[1], [0], [0], [1], [0, 0, 1, 1], [], []>} : vector<9x16xf32>, vector<16x128xf32>, vector<9x128xf32> -> vector<9x128xf32>
    %c0_29 = arith.constant 0 : index
    %c0_30 = arith.constant 0 : index
    %32 = vector.load %arg12[%c0_29, %c0_30] : memref<9x16xf32, #tpu.memory_space<vmem>>, vector<9x16xf32>
    %cst_31 = arith.constant dense<0.000000e+00> : vector<9x128xf32>
    %33 = tpu.matmul %32, %29, %cst_31 {dimension_numbers = #tpu.dot_dimension_numbers<[1], [0], [0], [1], [0, 0, 1, 1], [], []>} : vector<9x16xf32>, vector<16x128xf32>, vector<9x128xf32> -> vector<9x128xf32>
    %34 = arith.addf %31, %33 : vector<9x128xf32>
    %35 = arith.subf %31, %33 : vector<9x128xf32>
    %36 = math.absf %35 : vector<9x128xf32>
    %c0_32 = arith.constant 0 : index
    %37 = memref.load %arg0[%c0_32] : memref<2xf32, #tpu.memory_space<smem>>
    %c0_33 = arith.constant 0 : index
    %c0_34 = arith.constant 0 : index
    %38 = vector.load %arg13[%c0_33, %c0_34] : memref<1x128xf32, #tpu.memory_space<vmem>>, vector<1x128xf32>
    %39 = vector.broadcast %37 : f32 to vector<1x128xf32>
    %40 = arith.mulf %39, %38 : vector<1x128xf32>
    %c0_35 = arith.constant 0 : index
    %c0_36 = arith.constant 0 : index
    %41 = vector.load %arg14[%c0_35, %c0_36] : memref<1x128xf32, #tpu.memory_space<vmem>>, vector<1x128xf32>
    %42 = arith.addf %40, %41 : vector<1x128xf32>
    %cst_37 = arith.constant 0.000000e+00 : f32
    %43 = vector.broadcast %cst_37 : f32 to vector<1x128xf32>
    %44 = arith.maximumf %42, %43 : vector<1x128xf32>
    %c0_38 = arith.constant 0 : index
    %c0_39 = arith.constant 0 : index
    %45 = vector.load %arg15[%c0_38, %c0_39] : memref<128x128xf32, #tpu.memory_space<vmem>>, vector<128x128xf32>
    %cst_40 = arith.constant dense<0.000000e+00> : vector<1x128xf32>
    %46 = tpu.matmul %44, %45, %cst_40 {dimension_numbers = #tpu.dot_dimension_numbers<[1], [0], [0], [1], [0, 0, 1, 1], [], []>} : vector<1x128xf32>, vector<128x128xf32>, vector<1x128xf32> -> vector<1x128xf32>
    %c0_41 = arith.constant 0 : index
    %c0_42 = arith.constant 0 : index
    %47 = vector.load %arg16[%c0_41, %c0_42] : memref<1x128xf32, #tpu.memory_space<vmem>>, vector<1x128xf32>
    %48 = arith.addf %46, %47 : vector<1x128xf32>
    %49 = vector.extract_strided_slice %34 {offsets = [0, 0], sizes = [1, 128], strides = [1, 1]} : vector<9x128xf32> to vector<1x128xf32>
    %c0_43 = arith.constant 0 : index
    %c0_44 = arith.constant 0 : index
    %50 = vector.load %arg17[%c0_43, %c0_44] : memref<128x128xf32, #tpu.memory_space<vmem>>, vector<128x128xf32>
    %cst_45 = arith.constant dense<0.000000e+00> : vector<1x128xf32>
    %51 = tpu.matmul %49, %50, %cst_45 {dimension_numbers = #tpu.dot_dimension_numbers<[1], [0], [0], [1], [0, 0, 1, 1], [], []>} : vector<1x128xf32>, vector<128x128xf32>, vector<1x128xf32> -> vector<1x128xf32>
    %52 = vector.extract_strided_slice %36 {offsets = [0, 0], sizes = [1, 128], strides = [1, 1]} : vector<9x128xf32> to vector<1x128xf32>
    %c0_46 = arith.constant 0 : index
    %c0_47 = arith.constant 0 : index
    %53 = vector.load %arg18[%c0_46, %c0_47] : memref<128x128xf32, #tpu.memory_space<vmem>>, vector<128x128xf32>
    %cst_48 = arith.constant dense<0.000000e+00> : vector<1x128xf32>
    %54 = tpu.matmul %52, %53, %cst_48 {dimension_numbers = #tpu.dot_dimension_numbers<[1], [0], [0], [1], [0, 0, 1, 1], [], []>} : vector<1x128xf32>, vector<128x128xf32>, vector<1x128xf32> -> vector<1x128xf32>
    %55 = arith.addf %51, %54 : vector<1x128xf32>
    %c0_49 = arith.constant 0 : index
    %c0_50 = arith.constant 0 : index
    %56 = vector.load %arg21[%c0_49, %c0_50] : memref<128x128xf32, #tpu.memory_space<vmem>>, vector<128x128xf32>
    %cst_51 = arith.constant dense<0.000000e+00> : vector<1x128xf32>
    %57 = tpu.matmul %48, %56, %cst_51 {dimension_numbers = #tpu.dot_dimension_numbers<[1], [0], [0], [1], [0, 0, 1, 1], [], []>} : vector<1x128xf32>, vector<128x128xf32>, vector<1x128xf32> -> vector<1x128xf32>
    %58 = arith.addf %55, %57 : vector<1x128xf32>
    %c0_52 = arith.constant 0 : index
    %c0_53 = arith.constant 0 : index
    %59 = vector.load %arg22[%c0_52, %c0_53] : memref<1x128xf32, #tpu.memory_space<vmem>>, vector<1x128xf32>
    %60 = arith.addf %58, %59 : vector<1x128xf32>
    %61 = vector.extract_strided_slice %34 {offsets = [1, 0], sizes = [8, 128], strides = [1, 1]} : vector<9x128xf32> to vector<8x128xf32>
    %c0_54 = arith.constant 0 : index
    %c0_55 = arith.constant 0 : index
    %62 = vector.load %arg19[%c0_54, %c0_55] : memref<128x128xf32, #tpu.memory_space<vmem>>, vector<128x128xf32>
    %cst_56 = arith.constant dense<0.000000e+00> : vector<8x128xf32>
    %63 = tpu.matmul %61, %62, %cst_56 {dimension_numbers = #tpu.dot_dimension_numbers<[1], [0], [0], [1], [0, 0, 1, 1], [], []>} : vector<8x128xf32>, vector<128x128xf32>, vector<8x128xf32> -> vector<8x128xf32>
    %64 = vector.extract_strided_slice %36 {offsets = [1, 0], sizes = [8, 128], strides = [1, 1]} : vector<9x128xf32> to vector<8x128xf32>
    %c0_57 = arith.constant 0 : index
    %c0_58 = arith.constant 0 : index
    %65 = vector.load %arg20[%c0_57, %c0_58] : memref<128x128xf32, #tpu.memory_space<vmem>>, vector<128x128xf32>
    %cst_59 = arith.constant dense<0.000000e+00> : vector<8x128xf32>
    %66 = tpu.matmul %64, %65, %cst_59 {dimension_numbers = #tpu.dot_dimension_numbers<[1], [0], [0], [1], [0, 0, 1, 1], [], []>} : vector<8x128xf32>, vector<128x128xf32>, vector<8x128xf32> -> vector<8x128xf32>
    %67 = arith.addf %63, %66 : vector<8x128xf32>
    %68 = vector.broadcast %60 : vector<1x128xf32> to vector<8x128xf32>
    %69 = arith.addf %67, %68 : vector<8x128xf32>
    %cst_60 = arith.constant 0.000000e+00 : f32
    %70 = vector.broadcast %cst_60 : f32 to vector<8x128xf32>
    %71 = arith.maximumf %69, %70 : vector<8x128xf32>
    %c0_61 = arith.constant 0 : index
    %c0_62 = arith.constant 0 : index
    %72 = vector.load %arg23[%c0_61, %c0_62] : memref<1x128xf32, #tpu.memory_space<vmem>>, vector<1x128xf32>
    %cst_63 = arith.constant dense<0.000000e+00> : vector<1x8xf32>
    %73 = tpu.matmul %72, %71, %cst_63 {dimension_numbers = #tpu.dot_dimension_numbers<[1], [1], [0], [0], [0, 0, 1, 0], [], []>} : vector<1x128xf32>, vector<8x128xf32>, vector<1x8xf32> -> vector<1x8xf32>
    %c1 = arith.constant 1 : index
    %74 = memref.load %arg0[%c1] : memref<2xf32, #tpu.memory_space<smem>>
    %75 = vector.broadcast %74 : f32 to vector<1x8xf32>
    %76 = arith.addf %73, %75 : vector<1x8xf32>
    %c0_64 = arith.constant 0 : index
    %c0_65 = arith.constant 0 : index
    %77 = vector.load %arg24[%c0_64, %c0_65] : memref<1x8xf32, #tpu.memory_space<vmem>>, vector<1x8xf32>
    tpu.vector_store %arg24[%c0_64, %c0_65], %76 {strides = array<i32>} : memref<1x8xf32, #tpu.memory_space<vmem>>, vector<1x8xf32>,
    return
  }
}

</mosaic_0001>

<bundles_post_ra>
// kernel: tpu_custom_call.1
= control target key start
LH: loop header
LB: loop body
LE: loop exit
PB: predicated region body
PF: predicated region fallthrough
CT: control target
= control target key end

     0   :  { %s1614_s0 = inlined_call_operand.hbm [shape: f32[2], index: 0, kind: input, shape index: {}]   ;;  %s1615_s1 = inlined_call_operand.hbm [shape: f32[16,128], index: 1, kind: input, shape index: {}]   ;;  %s1616_s2 = inlined_call_operand.hbm [shape: f32[16,16], index: 2, kind: input, shape index: {}]   ;;  %s1617_s3 = inlined_call_operand.hbm [shape: f32[128,128], index: 3, kind: input, shape index: {}]   ;;  %s1618_s4 = inlined_call_operand.vmem [shape: f32[1,128], index: 4, kind: input, shape index: {}]   ;;  %s1619_s5 = inlined_call_operand.hbm [shape: f32[128,128], index: 5, kind: input, shape index: {}]   ;;  %s1620_s6 = inlined_call_operand.vmem [shape: f32[1,128], index: 6, kind: input, shape index: {}]   ;;  %s1621_s7 = inlined_call_operand.hbm [shape: f32[128,128], index: 7, kind: input, shape index: {}]   ;;  %s1622_s8 = inlined_call_operand.vmem [shape: f32[1,128], index: 8, kind: input, shape index: {}]   ;;  %s1623_s9 = inlined_call_operand.hbm [shape: f32[128,128], index: 9, kind: input, shape index: {}]   ;;  %s1624_s10 = inlined_call_operand.vmem [shape: f32[1,128], index: 10, kind: input, shape index: {}]   ;;  %s1625_s11 = inlined_call_operand.hbm [shape: f32[9,16], index: 11, kind: input, shape index: {}]   ;;  %s1626_s12 = inlined_call_operand.hbm [shape: f32[9,16], index: 12, kind: input, shape index: {}]   ;;  %s1627_s13 = inlined_call_operand.vmem [shape: f32[1,128], index: 13, kind: input, shape index: {}]   ;;  %s1628_s14 = inlined_call_operand.vmem [shape: f32[1,128], index: 14, kind: input, shape index: {}]   ;;  %s1629_s15 = inlined_call_operand.hbm [shape: f32[128,128], index: 15, kind: input, shape index: {}]   ;;  %s1630_s16 = inlined_call_operand.vmem [shape: f32[1,128], index: 16, kind: input, shape index: {}]   ;;  %s1631_s17 = inlined_call_operand.hbm [shape: f32[128,128], index: 17, kind: input, shape index: {}]   ;;  %s1632_s18 = inlined_call_operand.hbm [shape: f32[128,128], index: 18, kind: input, shape index: {}]   ;;  %s1633_s19 = inlined_call_operand.hbm [shape: f32[128,128], index: 19, kind: input, shape index: {}]   ;;  %s1634_s20 = inlined_call_operand.hbm [shape: f32[128,128], index: 20, kind: input, shape index: {}]   ;;  %s1635_s21 = inlined_call_operand.hbm [shape: f32[128,128], index: 21, kind: input, shape index: {}]   ;;  %s1636_s22 = inlined_call_operand.vmem [shape: f32[1,128], index: 22, kind: input, shape index: {}]   ;;  %s1637_s23 = inlined_call_operand.vmem [shape: f32[1,128], index: 23, kind: input, shape index: {}]   ;;  %s1638_s24 = inlined_call_operand.hbm [shape: f32[1,8], index: 24, kind: output, shape index: {}]  }
   0x1   :  { %1639 = sst [smem:[#allocation38_spill]] %s1614_s0 }
   0x2   :  { %1640 = sst [smem:[#allocation39_spill]] %s1615_s1 }
   0x3   :  { %1641 = sst [smem:[#allocation40_spill]] %s1616_s2 }
   0x4   :  { %1642 = sst [smem:[#allocation41_spill]] %s1617_s3 }
   0x5   :  { %1643 = sst [smem:[#allocation42_spill]] %s1618_s4 }
   0x6   :  { %1644 = sst [smem:[#allocation43_spill]] %s1619_s5 }
   0x7   :  { %1645 = sst [smem:[#allocation44_spill]] %s1620_s6 }
   0x8   :  { %1646 = sst [smem:[#allocation45_spill]] %s1621_s7 }
   0x9   :  { %1647 = sst [smem:[#allocation46_spill]] %s1622_s8 }
   0xa   :  { %29 = vsyncpa [#allocation5], 0 }
   0xb   :  { %30 = vsyncpa [#allocation3], 0 }
   0xc   :  { %31 = vsyncpa [#allocation8], 0 }
   0xd   :  { %32 = vsyncpa [#allocation11], 0 }
   0xe   :  { %33 = vsyncpa [#allocation14], 0 }
   0xf   :  { %34 = vsyncpa [#allocation17], 0 }
  0x10   :  { %35 = vsyncpa [#allocation20], 0 }
  0x11   :  { %36 = vsyncpa [#allocation23], 0 }
  0x12   :  { %37 = vsyncpa [#allocation26], 0 }
  0x13   :  { %38 = vsyncpa [#allocation4], 0  ;;  %s1648_s27 = sld [smem:[#allocation40_spill]]  ;;  %s1330_s6 = smov [#allocation7]  }
  0x14   :  { %s67_s2 = sshll.u32 %s1330_s6, 4  ;;  %s1649_s7 = sld [smem:[#allocation43_spill]]  ;;  %s68_s2 = int_to_ptr.vmem [resolvable:$true] %s67_s2 }
  0x15   :  { %s1331_s3 = smov 128   ;;  %s1332_s25 = smov 8  }
  0x16   :  { %s1333_s8 = smov [#allocation10]   ;;  %s123_s26 = sshll.u32 %s1623_s9, 4  ;;  %s124_s26 = int_to_ptr.hbm [resolvable:$true] %s123_s26 }
  0x17   :  { %s95_s4 = sshll.u32 %s1333_s8, 4  ;;  %s151_s29 = sshll.u32 %s1626_s12, 4  ;;  %s96_s4 = int_to_ptr.vmem [resolvable:$true] %s95_s4  ;;  %s152_s29 = int_to_ptr.hbm [resolvable:$true] %s151_s29 }
  0x18   :  { %s1334_s0 = smov [#allocation13]   ;;  %s183_s1 = sshll.u32 %s1631_s17, 4  ;;  %s184_s1 = int_to_ptr.hbm [resolvable:$true] %s183_s1 }
  0x19   :  { %s65_s28 = sshll.u32 %s1648_s27, 4  ;;  %s1336_s5 = smov [#allocation19]   ;;  %s66_s28 = int_to_ptr.hbm [resolvable:$true] %s65_s28 }
  0x1a   :  { %s93_s30 = sshll.u32 %s1649_s7, 4  ;;  %s125_s7 = sshll.u32 %s1334_s0, 4  ;;  %s94_s30 = int_to_ptr.hbm [resolvable:$true] %s93_s30  ;;  %s126_s7 = int_to_ptr.vmem [resolvable:$true] %s125_s7 }
  0x1b   :  { %73 = dma.hbm_to_vmem [thread:$0]  %s66_s28, 256, %s68_s2, [#allocation8], %s1331_s3, %s1331_s3, %s1332_s25  }
  0x1c   :  { %101 = dma.hbm_to_vmem [thread:$0]  %s94_s30, 2048, %s96_s4, [#allocation11], %s1331_s3, %s1331_s3, %s1332_s25  }
  0x1d   :  { %131 = dma.hbm_to_vmem [thread:$0]  %s124_s26, 2048, %s126_s7, [#allocation14], %s1331_s3, %s1331_s3, %s1332_s25  }
  0x1e   :  { %s1335_s28 = smov [#allocation16]   ;;  %s209_s4 = sshll.u32 %s1633_s19, 4  ;;  %s210_s4 = int_to_ptr.hbm [resolvable:$true] %s209_s4 }
  0x1f   :  { %s153_s9 = sshll.u32 %s1335_s28, 4  ;;  %s185_s27 = sshll.u32 %s1336_s5, 4  ;;  %s154_s9 = int_to_ptr.vmem [resolvable:$true] %s153_s9  ;;  %s186_s27 = int_to_ptr.vmem [resolvable:$true] %s185_s27 }
  0x20   :  { %159 = dma.hbm_to_vmem [thread:$0]  %s152_s29, 256, %s154_s9, [#allocation17], %s1331_s3, %s1331_s3, %s1332_s25  }
  0x21   :  { %191 = dma.hbm_to_vmem [thread:$0]  %s184_s1, 2048, %s186_s27, [#allocation20], %s1331_s3, %s1331_s3, %s1332_s25  }
  0x22   :  { %s1337_s26 = smov [#allocation22]   ;;  %s1650_s7 = sld [smem:[#allocation38_spill]] }
  0x23   :  { %s211_s17 = sshll.u32 %s1337_s26, 4  ;;  %s1651_s9 = sld [smem:[#allocation39_spill]]  ;;  %s212_s17 = int_to_ptr.vmem [resolvable:$true] %s211_s17 }
  0x24   :  { %217 = dma.hbm_to_vmem [thread:$0]  %s210_s4, 2048, %s212_s17, [#allocation23], %s1331_s3, %s1331_s3, %s1332_s25  }
  0x25   :  { %s1338_s8 = smov [#allocation2]   ;;  %s1339_s1 = smov [#allocation6]  }
  0x26   :  { %s54_s12 = sshll.u32 %s1339_s1, 4  ;;  %s1652_s27 = sld [smem:[#allocation41_spill]]  ;;  %s55_s12 = int_to_ptr.vmem [resolvable:$true] %s54_s12 }
  0x27   :  { %s1653_s6 = sld [smem:[#allocation45_spill]]  ;;  %s138_s1 = sshll.u32 %s1625_s11, 4  ;;  %s139_s1 = int_to_ptr.hbm [resolvable:$true] %s138_s1 }
  0x28   :  { %s44_s28 = sshll.u32 %s1650_s7, 4  ;;  %s1340_s7 = smov [#allocation9]   ;;  %s45_s28 = int_to_ptr.hbm [resolvable:$true] %s44_s28 }
  0x29   :  { %s52_s2 = sshll.u32 %s1651_s9, 4  ;;  %s80_s19 = sshll.u32 %s1340_s7, 4  ;;  %s53_s2 = int_to_ptr.hbm [resolvable:$true] %s52_s2  ;;  %s81_s19 = int_to_ptr.vmem [resolvable:$true] %s80_s19 }
  0x2a   :  { %47 = dma.hbm_to_smem %s45_s28, 16, %s1338_s8, [#allocation5]  }
  0x2b   :  { %60 = dma.hbm_to_vmem [thread:$0]  %s53_s2, 256, %s55_s12, [#allocation3], %s1331_s3, %s1331_s3, %s1332_s25  }
  0x2c   :  { %s78_s26 = sshll.u32 %s1652_s27, 4  ;;  %s1341_s28 = smov [#allocation12]   ;;  %s79_s26 = int_to_ptr.hbm [resolvable:$true] %s78_s26 }
  0x2d   :  { %s108_s0 = sshll.u32 %s1653_s6, 4  ;;  %s110_s29 = sshll.u32 %s1341_s28, 4  ;;  %s109_s0 = int_to_ptr.hbm [resolvable:$true] %s108_s0  ;;  %s111_s29 = int_to_ptr.vmem [resolvable:$true] %s110_s29 }
  0x2e   :  { %86 = dma.hbm_to_vmem [thread:$0]  %s79_s26, 2048, %s81_s19, [#allocation8], %s1331_s3, %s1331_s3, %s1332_s25  }
  0x2f   :  { %116 = dma.hbm_to_vmem [thread:$0]  %s109_s0, 2048, %s111_s29, [#allocation11], %s1331_s3, %s1331_s3, %s1332_s25  }
  0x30   :  { %s168_s30 = sshll.u32 %s1629_s15, 4  ;;  %s1342_s5 = smov [#allocation15]   ;;  %s169_s30 = int_to_ptr.hbm [resolvable:$true] %s168_s30 }
  0x31   :  { %s140_s27 = sshll.u32 %s1342_s5, 4  ;;  %s1343_s26 = smov [#allocation18]   ;;  %s141_s27 = int_to_ptr.vmem [resolvable:$true] %s140_s27 }
  0x32   :  { %146 = dma.hbm_to_vmem [thread:$0]  %s139_s1, 256, %s141_s27, [#allocation14], %s1331_s3, %s1331_s3, %s1332_s25  }
  0x33   :  { %s170_s11 = sshll.u32 %s1343_s26, 4  ;;  %s196_s6 = sshll.u32 %s1632_s18, 4  ;;  %s171_s11 = int_to_ptr.vmem [resolvable:$true] %s170_s11  ;;  %s197_s6 = int_to_ptr.hbm [resolvable:$true] %s196_s6 }
  0x34   :  { %176 = dma.hbm_to_vmem [thread:$0]  %s169_s30, 2048, %s171_s11, [#allocation17], %s1331_s3, %s1331_s3, %s1332_s25  }
  0x35   :  { %s222_s7 = sshll.u32 %s1634_s20, 4  ;;  %s1344_s19 = smov [#allocation21]   ;;  %s223_s7 = int_to_ptr.hbm [resolvable:$true] %s222_s7 }
  0x36   :  { %s198_s28 = sshll.u32 %s1344_s19, 4  ;;  %s1345_s29 = smov [#allocation24]   ;;  %s199_s28 = int_to_ptr.vmem [resolvable:$true] %s198_s28 }
  0x37   :  { %204 = dma.hbm_to_vmem [thread:$0]  %s197_s6, 2048, %s199_s28, [#allocation20], %s1331_s3, %s1331_s3, %s1332_s25  }
  0x38   :  { %s224_s18 = sshll.u32 %s1345_s29, 4  ;;  %s235_s1 = sshll.u32 %s1635_s21, 4  ;;  %s225_s18 = int_to_ptr.vmem [resolvable:$true] %s224_s18  ;;  %s236_s1 = int_to_ptr.hbm [resolvable:$true] %s235_s1 }
  0x39   :  { %230 = dma.hbm_to_vmem [thread:$0]  %s223_s7, 2048, %s225_s18, [#allocation23], %s1331_s3, %s1331_s3, %s1332_s25  }
  0x3a   :  { %s1346_s20 = smov [#allocation25]  }
  0x3b   :  { %s237_s2 = sshll.u32 %s1346_s20, 4  ;;  %s238_s2 = int_to_ptr.vmem [resolvable:$true] %s237_s2 }
  0x3c   :  { %243 = dma.hbm_to_vmem [thread:$0]  %s236_s1, 2048, %s238_s2, [#allocation26], %s1331_s3, %s1331_s3, %s1332_s25  }
  0x3d   :  { %1310 = dma.done.wait [#allocation5], 16  }
  0x3e   :  { %1311 = vsyncadd [#allocation5], 4294967280 }
  0x3f   :  { %1312 = dma.done.wait [#allocation3], 256  }
  0x40   :  { %1313 = vsyncadd [#allocation3], 4294967040 }
  0x41   :  { %1314 = dma.done.wait [#allocation8], 2304  }
  0x42   :  { %1315 = vsyncadd [#allocation8], 4294964992 }
  0x43   :  { %1316 = dma.done.wait [#allocation11], 4096  }
  0x44   :  { %1317 = vsyncadd [#allocation11], 4294963200 }
  0x45   :  { %1318 = dma.done.wait [#allocation14], 2304  }
  0x46   :  { %1319 = vsyncadd [#allocation14], 4294964992 }
  0x47   :  { %1320 = dma.done.wait [#allocation17], 2304  }
  0x48   :  { %1321 = vsyncadd [#allocation17], 4294964992 }
  0x49   :  { %1322 = dma.done.wait [#allocation20], 4096  }
  0x4a   :  { %1323 = vsyncadd [#allocation20], 4294963200 }
  0x4b   :  { %1324 = dma.done.wait [#allocation23], 4096  }
  0x4c   :  { %1325 = vsyncadd [#allocation23], 4294963200 }
  0x4d   :  { %1326 = dma.done.wait [#allocation26], 2048  }
  0x4e   :  { %1327 = vsyncadd [#allocation26], 4294965248 }
  0x4f   :  { %308 = sfence }
  0x50   :  { %v1560_v0 = vld [vmem:[#allocation6 + $0x8] sm:$0xff]  ;;  %v1562_v1 = vld [vmem:[#allocation6] sm:$0xff]  ;;  %v1565_v2 = vld [vmem:[#allocation7] sm:$0xff]  ;;  %vm313_vm0 = vcmask 130048   ;;  %s1654_s25 = sld [smem:[#allocation42_spill]]  ;;  %vm803_vm1 = vcmask 1046528  }
  0x51   :  { %334 = vmatpush.msra.mxu2 %v1560_v0  ;;  %v360_v3 = vld [vmem:[#allocation9 + $0x78] sm:$0xff]  ;;  %v359_v4 = vld [vmem:[#allocation9 + $0x70] sm:$0xff]  ;;  %v358_v5 = vld [vmem:[#allocation9 + $0x68] sm:$0xff]  ;;  %s1655_s5 = sld [smem:[#allocation44_spill]]  ;;  %s1347_s9 = smov [#allocation27]   ;;  %vm880_vm2 = vcmask 57344  }
  0x52   :  { %365 = vmatpush.msra.mxu1 %v360_v3  ;;  %v357_v6 = vld [vmem:[#allocation9 + $0x60] sm:$0xff]  ;;  %v356_v7 = vld [vmem:[#allocation9 + $0x58] sm:$0xff]  ;;  %v355_v9 = vld [vmem:[#allocation9 + $0x50] sm:$0xff]  ;;  %s1656_s11 = sld [smem:[#allocation46_spill]]  ;;  %s887_s8 = sshll.u32 %s1347_s9, 4  ;;  %s888_s8 = int_to_ptr.vmem [resolvable:$true] %s887_s8 }
  0x53   :  { %335 = vmatpush.msra.mxu2 %v1562_v1  ;;  %v1570_v8 = vld [vmem:[#allocation7 + $0x8] sm:$0xff]  ;;  %v354_v10 = vld [vmem:[#allocation9 + $0x48] sm:$0xff]  ;;  %v353_v11 = vld [vmem:[#allocation9 + $0x40] sm:$0xff]  ;;  %s614_s4 = sld [smem:[#allocation2]] }
  0x54   :  { %907 = vmatmul.msk.f32.vlgmr.msra.gmra.mxu2 %vm313_vm0, %v1565_v2  ;;  %366 = vmatpush.msra.mxu1 %v359_v4  ;;  %v352_v12 = vld [vmem:[#allocation9 + $0x38] sm:$0xff]  ;;  %v351_v13 = vld [vmem:[#allocation9 + $0x30] sm:$0xff]  ;;  %v350_v14 = vld [vmem:[#allocation9 + $0x28] sm:$0xff]  ;;  %s915_s18 = sld [smem:[#allocation2 + $0x1]] }
  0x55   :  { %v349_v15 = vld [vmem:[#allocation9 + $0x20] sm:$0xff]  ;;  %v348_v16 = vld [vmem:[#allocation9 + $0x18] sm:$0xff]  ;;  %v347_v17 = vld [vmem:[#allocation9 + $0x10] sm:$0xff] }
  0x56   :  { %367 = vmatpush.msra.mxu1 %v358_v5  ;;  %v346_v18 = vld [vmem:[#allocation9 + $0x8] sm:$0xff]  ;;  %v345_v19 = vld [vmem:[#allocation9] sm:$0xff]  ;;  %v405_v20 = vld [vmem:[#allocation10 + $0x78] sm:$0xff] }
  0x57   :  { %v404_v21 = vld [vmem:[#allocation10 + $0x70] sm:$0xff]  ;;  %410 = vmatpush.msrb.mxu2 %v405_v20  ;;  %v403_v22 = vld [vmem:[#allocation10 + $0x68] sm:$0xff]  ;;  %v402_v23 = vld [vmem:[#allocation10 + $0x60] sm:$0xff] }
  0x58   :  { %368 = vmatpush.msra.mxu1 %v357_v6  ;;  %v401_v24 = vld [vmem:[#allocation10 + $0x58] sm:$0xff]  ;;  %v400_v25 = vld [vmem:[#allocation10 + $0x50] sm:$0xff]  ;;  %v399_v26 = vld [vmem:[#allocation10 + $0x48] sm:$0xff] }
  0x59   :  { %411 = vmatpush.msrb.mxu2 %v404_v21  ;;  %v398_v27 = vld [vmem:[#allocation10 + $0x40] sm:$0xff]  ;;  %v397_v28 = vld [vmem:[#allocation10 + $0x38] sm:$0xff]  ;;  %v396_v29 = vld [vmem:[#allocation10 + $0x30] sm:$0xff] }
  0x5a   :  { %369 = vmatpush.msra.mxu1 %v356_v7  ;;  %v395_v30 = vld [vmem:[#allocation10 + $0x28] sm:$0xff]  ;;  %v394_v31 = vld [vmem:[#allocation10 + $0x20] sm:$0xff]  ;;  %v393_v34 = vld [vmem:[#allocation10 + $0x18] sm:$0xff] }
  0x5b   :  { %412 = vmatpush.msrb.mxu2 %v403_v22  ;;  %v392_v37 = vld [vmem:[#allocation10 + $0x10] sm:$0xff]  ;;  %v391_v38 = vld [vmem:[#allocation10 + $0x8] sm:$0xff]  ;;  %v390_v39 = vld [vmem:[#allocation10] sm:$0xff] }
  0x5c   :  { %908 = vmatmul.msk.f32.gmra.mxu2 %vm313_vm0, %v1570_v8  ;;  %370 = vmatpush.msra.mxu1 %v355_v9  ;;  %v934_v40 = vld [vmem:[%s1654_s25] ss:$0 sm:$0xff]  ;;  %v473_v47 = vld [vmem:[#allocation12 + $0x78] sm:$0xff]  ;;  %v472_v48 = vld [vmem:[#allocation12 + $0x70] sm:$0xff] }
  0x5d   :  { %413 = vmatpush.msrb.mxu2 %v402_v23  ;;  %478 = vmatpush.msra.mxu0 %v473_v47  ;;  %v471_v49 = vld [vmem:[#allocation12 + $0x68] sm:$0xff]  ;;  %v470_v50 = vld [vmem:[#allocation12 + $0x60] sm:$0xff]  ;;  %v469_v51 = vld [vmem:[#allocation12 + $0x58] sm:$0xff] }
  0x5e   :  { %371 = vmatpush.msra.mxu1 %v354_v10  ;;  %v468_v52 = vld [vmem:[#allocation12 + $0x50] sm:$0xff]  ;;  %v467_v54 = vld [vmem:[#allocation12 + $0x48] sm:$0xff]  ;;  %v466_v55 = vld [vmem:[#allocation12 + $0x40] sm:$0xff] }
  0x5f   :  { %414 = vmatpush.msrb.mxu2 %v401_v24  ;;  %479 = vmatpush.msra.mxu0 %v472_v48  ;;  %v465_v56 = vld [vmem:[#allocation12 + $0x38] sm:$0xff]  ;;  %v464_v57 = vld [vmem:[#allocation12 + $0x30] sm:$0xff]  ;;  %v935_v58 = vld [vmem:[%s1655_s5] ss:$0 sm:$0xff] }
  0x60   :  { %372 = vmatpush.msra.mxu1 %v353_v11  ;;  %v463_v60 = vld [vmem:[#allocation12 + $0x28] sm:$0xff]  ;;  %v462_v62 = vld [vmem:[#allocation12 + $0x20] sm:$0xff]  ;;  %v518_v5 = vld [vmem:[#allocation13 + $0x78] sm:$0xff] }
  0x61   :  { %415 = vmatpush.msrb.mxu2 %v400_v25  ;;  %480 = vmatpush.msra.mxu0 %v471_v49  ;;  %v459_v3 = vld [vmem:[#allocation12 + $0x8] sm:$0xff]  ;;  %v458_v4 = vld [vmem:[#allocation12] sm:$0xff]  ;;  %v517_v6 = vld [vmem:[#allocation13 + $0x70] sm:$0xff] }
  0x62   :  { %373 = vmatpush.msra.mxu1 %v352_v12  ;;  %v516_v7 = vld [vmem:[#allocation13 + $0x68] sm:$0xff]  ;;  %v515_v9 = vld [vmem:[#allocation13 + $0x60] sm:$0xff]  ;;  %v514_v10 = vld [vmem:[#allocation13 + $0x58] sm:$0xff] }
  0x63   :  { %416 = vmatpush.msrb.mxu2 %v399_v26  ;;  %481 = vmatpush.msra.mxu0 %v470_v50  ;;  %v512_v11 = vld [vmem:[#allocation13 + $0x48] sm:$0xff]  ;;  %v511_v12 = vld [vmem:[#allocation13 + $0x40] sm:$0xff]  ;;  %v505_v21 = vld [vmem:[#allocation13 + $0x10] sm:$0xff] }
  0x64   :  { %374 = vmatpush.msra.mxu1 %v351_v13  ;;  %v509_v13 = vld [vmem:[#allocation13 + $0x30] sm:$0xff]  ;;  %v504_v22 = vld [vmem:[#allocation13 + $0x8] sm:$0xff]  ;;  %v503_v23 = vld [vmem:[#allocation13] sm:$0xff] }
  0x65   :  { %417 = vmatpush.msrb.mxu2 %v398_v27  ;;  %482 = vmatpush.msra.mxu0 %v469_v51  ;;  %v636_v24 = vld [vmem:[#allocation18 + $0x78] sm:$0xff]  ;;  %v635_v25 = vld [vmem:[#allocation18 + $0x70] sm:$0xff]  ;;  %v634_v26 = vld [vmem:[#allocation18 + $0x68] sm:$0xff] }
  0x66   :  { %375 = vmatpush.msra.mxu1 %v350_v14  ;;  %v508_v14 = vld [vmem:[#allocation13 + $0x28] sm:$0xff]  ;;  %v633_v27 = vld [vmem:[#allocation18 + $0x60] sm:$0xff] }
  0x67   :  { %418 = vmatpush.msrb.mxu2 %v397_v28  ;;  %483 = vmatpush.msra.mxu0 %v468_v52  ;;  %v936_v28 = vld [vmem:[%s1656_s11] ss:$0 sm:$0xff]  ;;  %v622_v47 = vld [vmem:[#allocation18 + $0x8] sm:$0xff] }
  0x68   :  { %376 = vmatpush.msra.mxu1 %v349_v15  ;;  %v507_v15 = vld [vmem:[#allocation13 + $0x20] sm:$0xff] }
  0x69   :  { %419 = vmatpush.msrb.mxu2 %v396_v29  ;;  %484 = vmatpush.msra.mxu0 %v467_v54  ;;  %v618_v49 = vld [vmem:[%s1628_s14] sm:$0x1]  ;;  %v688_v54 = vld [vmem:[#allocation21 + $0x70] sm:$0xff] }
  0x6a   :  { %377 = vmatpush.msra.mxu1 %v348_v16  ;;  %v621_v51 = vld [vmem:[#allocation18] sm:$0xff] }
  0x6b   :  { %420 = vmatpush.msrb.mxu2 %v395_v30  ;;  %485 = vmatpush.msra.mxu0 %v466_v55  ;;  %v687_v55 = vld [vmem:[#allocation21 + $0x68] sm:$0xff] }
  0x6c   :  { %378 = vmatpush.msra.mxu1 %v347_v17 }
  0x6d   :  { %421 = vmatpush.msrb.mxu2 %v394_v31  ;;  %486 = vmatpush.msra.mxu0 %v465_v56  ;;  %v686_v56 = vld [vmem:[#allocation21 + $0x60] sm:$0xff] }
  0x6e   :  { %379 = vmatpush.msra.mxu1 %v346_v18  ;;  %v506_v18 = vld [vmem:[#allocation13 + $0x18] sm:$0xff] }
  0x6f   :  { %422 = vmatpush.msrb.mxu2 %v393_v34  ;;  %487 = vmatpush.msra.mxu0 %v464_v57  ;;  %v685_v57 = vld [vmem:[#allocation21 + $0x58] sm:$0xff] }
  0x70   :  { %380 = vmatpush.msra.mxu1 %v345_v19 }
  0x71   :  { %423 = vmatpush.msrb.mxu2 %v392_v37  ;;  %488 = vmatpush.msra.mxu0 %v463_v60  ;;  %v630_v37 = vld [vmem:[#allocation18 + $0x48] sm:$0xff] }
  0x73   :  { %424 = vmatpush.msrb.mxu2 %v391_v38  ;;  %489 = vmatpush.msra.mxu0 %v462_v62  ;;  %v629_v38 = vld [vmem:[#allocation18 + $0x40] sm:$0xff]  ;;  %v799_v62 = vld [vmem:[#allocation24 + $0x70] sm:$0xff] }
  0x75   :  { %425 = vmatpush.msrb.mxu2 %v390_v39  ;;  %v628_v39 = vld [vmem:[#allocation18 + $0x38] sm:$0xff] }
  0xd7   :  { %v337_v32 = vpop.f32.mrf.mxu2 }
  0xd8   :  { %v343_v33 = vadd.f32 %v337_v32, %v1562_v1  ;;  %v460_v1 = vld [vmem:[#allocation12 + $0x10] sm:$0xff] }
  0xda   :  { %381 = vmatmul.f32.vlgmr.msra.gmra.mxu1 %v343_v33 }
  0xdf   :  { %v340_v35 = vpop.f32.mrf.mxu2 }
  0xe0   :  { %v344_v36 = vadd.f32 %v340_v35, %v1560_v0  ;;  %v461_v0 = vld [vmem:[#allocation12 + $0x18] sm:$0xff] }
  0xe1   :  { %490 = vmatpush.msra.mxu0 %v461_v0  ;;  %v632_v35 = vld [vmem:[#allocation18 + $0x58] sm:$0xff]  ;;  %v682_v0 = vld [vmem:[#allocation21 + $0x40] sm:$0xff] }
  0xe2   :  { %384 = vmatmul.f32.gmra.mxu1 %v344_v36  ;;  %v631_v36 = vld [vmem:[#allocation18 + $0x50] sm:$0xff] }
  0xe3   :  { %491 = vmatpush.msra.mxu0 %v460_v1  ;;  %v797_v1 = vld [vmem:[#allocation24 + $0x60] sm:$0xff] }
  0xe5   :  { %492 = vmatpush.msra.mxu0 %v459_v3  ;;  %v681_v3 = vld [vmem:[#allocation21 + $0x38] sm:$0xff] }
  0xe7   :  { %493 = vmatpush.msra.mxu0 %v458_v4  ;;  %v796_v4 = vld [vmem:[#allocation24 + $0x58] sm:$0xff] }
  0xe9   :  { %638 = vmatpush.msrb.mxu0 %v636_v24  ;;  %v675_v24 = vld [vmem:[#allocation21 + $0x8] sm:$0xff] }
  0xeb   :  { %639 = vmatpush.msrb.mxu0 %v635_v25  ;;  %v742_v25 = vld [vmem:[#allocation25 + $0x60] sm:$0xff] }
  0xed   :  { %640 = vmatpush.msrb.mxu0 %v634_v26  ;;  %v578_v26 = vld [vmem:[#allocation16 + $0x8] sm:$0x1] }
  0xef   :  { %641 = vmatpush.msrb.mxu0 %v633_v27  ;;  %v547_v27 = vld [vmem:[#allocation15 + $0x8] sm:$0x1] }
  0xf1   :  { %642 = vmatpush.msrb.mxu0 %v632_v35  ;;  %v739_v35 = vld [vmem:[#allocation25 + $0x48] sm:$0xff] }
  0xf3   :  { %643 = vmatpush.msrb.mxu0 %v631_v36  ;;  %v782_v36 = vld [vmem:[#allocation22 + $0x68] sm:$0xff] }
  0xf5   :  { %644 = vmatpush.msrb.mxu0 %v630_v37  ;;  %v668_v37 = vld [vmem:[#allocation19 + $0x50] sm:$0xff] }
  0xf7   :  { %645 = vmatpush.msrb.mxu0 %v629_v38  ;;  %v738_v38 = vld [vmem:[#allocation25 + $0x40] sm:$0xff] }
  0xf9   :  { %646 = vmatpush.msrb.mxu0 %v628_v39  ;;  %v781_v39 = vld [vmem:[#allocation22 + $0x60] sm:$0xff] }
 0x157   :  { %v382_v41 = vpop.f32.mrf.mxu1 }
 0x158   :  { %v383_v42 = vadd.f32 %v934_v40, %v382_v41  ;;  %v626_v41 = vld [vmem:[#allocation18 + $0x28] sm:$0xff] }
 0x15a   :  { %v388_v43 = vmax.f32 %v383_v42, 0.0  ;;  %v625_v42 = vld [vmem:[#allocation18 + $0x20] sm:$0xff] }
 0x15c   :  { %426 = vmatmul.f32.vlgmr.msrb.gmra.mxu2 %v388_v43  ;;  %v624_v43 = vld [vmem:[#allocation18 + $0x18] sm:$0xff] }
 0x15f   :  { %v385_v44 = vpop.f32.mrf.mxu1 }
 0x160   :  { %v386_v45 = vadd.f32 %v934_v40, %v385_v44  ;;  %v627_v40 = vld [vmem:[#allocation18 + $0x30] sm:$0xff] }
 0x161   :  { %647 = vmatpush.msrb.mxu0 %v627_v40  ;;  %v623_v44 = vld [vmem:[#allocation18 + $0x10] sm:$0xff]  ;;  %v667_v40 = vld [vmem:[#allocation19 + $0x48] sm:$0xff] }
 0x162   :  { %v389_v46 = vmax.f32 %v386_v45, 0.0  ;;  %v615_v45 = vld [vmem:[%s1627_s13] sm:$0x1] }
 0x163   :  { %648 = vmatpush.msrb.mxu0 %v626_v41  ;;  %v737_v41 = vld [vmem:[#allocation25 + $0x38] sm:$0xff] }
 0x164   :  { %429 = vmatmul.f32.gmra.mxu2 %v389_v46  ;;  %v616_v46 = vstv %s614_s4 }
 0x165   :  { %649 = vmatpush.msrb.mxu0 %v625_v42  ;;  %v617_v48 = vmul.f32 %v616_v46, %v615_v45  ;;  %v780_v42 = vld [vmem:[#allocation22 + $0x58] sm:$0xff]  ;;  %v779_v45 = vld [vmem:[#allocation22 + $0x50] sm:$0xff] }
 0x166   :  { %v665_v46 = vld [vmem:[#allocation19 + $0x38] sm:$0xff] }
 0x167   :  { %650 = vmatpush.msrb.mxu0 %v624_v43  ;;  %v619_v50 = vadd.f32 %v618_v49, %v617_v48  ;;  %v666_v43 = vld [vmem:[#allocation19 + $0x40] sm:$0xff]  ;;  %v778_v48 = vld [vmem:[#allocation22 + $0x48] sm:$0xff]  ;;  %v664_v49 = vld [vmem:[#allocation19 + $0x30] sm:$0xff] }
 0x169   :  { %651 = vmatpush.msrb.mxu0 %v623_v44  ;;  %v620_v52 = vmax.f32 %v619_v50, 0.0  ;;  %v736_v44 = vld [vmem:[#allocation25 + $0x30] sm:$0xff]  ;;  %v734_v50 = vld [vmem:[#allocation25 + $0x20] sm:$0xff] }
 0x16b   :  { %652 = vmatpush.msrb.mxu0 %v622_v47  ;;  %v735_v47 = vld [vmem:[#allocation25 + $0x28] sm:$0xff] }
 0x16d   :  { %653 = vmatpush.msrb.mxu0 %v621_v51  ;;  %v777_v51 = vld [vmem:[#allocation22 + $0x40] sm:$0xff] }
 0x1df   :  { %v427_v53 = vpop.f32.mrf.mxu2 }
 0x1e0   :  { %v428_v63 = vadd.f32 %v935_v58, %v427_v53  ;;  %v689_v53 = vld [vmem:[#allocation21 + $0x78] sm:$0xff] }
 0x1e7   :  { %v430_v59 = vpop.f32.mrf.mxu2 }
 0x1e8   :  { %v431_v61 = vadd.f32 %v935_v58, %v430_v59  ;;  %v684_v58 = vld [vmem:[#allocation21 + $0x50] sm:$0xff]  ;;  %v800_v59 = vld [vmem:[#allocation24 + $0x78] sm:$0xff] }
 0x1ea   :  { %447 = vmatpush.msra.mxu3 %v431_v61 }
 0x1ec   :  { %448 = vmatpush.msra.mxu3 %v428_v63 }
 0x1ed   :  { %909 = vmatmul.msk.f32.vlgmr.msra.gmra.mxu3 %vm313_vm0, %v1565_v2  ;;  %v513_v2 = vld [vmem:[#allocation13 + $0x50] sm:$0xff] }
 0x1ee   :  { %523 = vmatpush.msrb.mxu3 %v518_v5  ;;  %v680_v5 = vld [vmem:[#allocation21 + $0x30] sm:$0xff] }
 0x1f0   :  { %524 = vmatpush.msrb.mxu3 %v517_v6  ;;  %v937_v6 = vld [vmem:[%s1624_s10] ss:$0 sm:$0xff] }
 0x1f2   :  { %525 = vmatpush.msrb.mxu3 %v516_v7  ;;  %v795_v7 = vld [vmem:[#allocation24 + $0x50] sm:$0xff] }
 0x1f4   :  { %526 = vmatpush.msrb.mxu3 %v515_v9 }
 0x1f5   :  { %910 = vmatmul.msk.f32.gmra.mxu3 %vm313_vm0, %v1570_v8  ;;  %v510_v8 = vld [vmem:[#allocation13 + $0x38] sm:$0xff] }
 0x1f6   :  { %527 = vmatpush.msrb.mxu3 %v514_v10 }
 0x1f8   :  { %528 = vmatpush.msrb.mxu3 %v513_v2  ;;  %v679_v2 = vld [vmem:[#allocation21 + $0x28] sm:$0xff] }
 0x1fa   :  { %529 = vmatpush.msrb.mxu3 %v512_v11  ;;  %v794_v11 = vld [vmem:[#allocation24 + $0x48] sm:$0xff] }
 0x1fc   :  { %530 = vmatpush.msrb.mxu3 %v511_v12 }
 0x1fe   :  { %531 = vmatpush.msrb.mxu3 %v510_v8  ;;  %v577_v8 = vld [vmem:[#allocation16] sm:$0xff] }
 0x200   :  { %532 = vmatpush.msrb.mxu3 %v509_v13  ;;  %v546_v13 = vld [vmem:[#allocation15] sm:$0xff] }
 0x202   :  { %533 = vmatpush.msrb.mxu3 %v508_v14  ;;  %v678_v14 = vld [vmem:[#allocation21 + $0x20] sm:$0xff] }
 0x204   :  { %534 = vmatpush.msrb.mxu3 %v507_v15  ;;  %v745_v15 = vld [vmem:[#allocation25 + $0x78] sm:$0xff] }
 0x206   :  { %535 = vmatpush.msrb.mxu3 %v506_v18  ;;  %v677_v18 = vld [vmem:[#allocation21 + $0x18] sm:$0xff] }
 0x208   :  { %536 = vmatpush.msrb.mxu3 %v505_v21  ;;  %v676_v21 = vld [vmem:[#allocation21 + $0x10] sm:$0xff] }
 0x20a   :  { %537 = vmatpush.msrb.mxu3 %v504_v22  ;;  %v743_v22 = vld [vmem:[#allocation25 + $0x68] sm:$0xff] }
 0x20c   :  { %538 = vmatpush.msrb.mxu3 %v503_v23  ;;  %v671_v23 = vld [vmem:[#allocation19 + $0x68] sm:$0xff] }
 0x20e   :  { %690 = vmatpush.msra.mxu3 %v689_v53  ;;  %v663_v53 = vld [vmem:[#allocation19 + $0x28] sm:$0xff] }
 0x210   :  { %691 = vmatpush.msra.mxu3 %v688_v54  ;;  %v662_v54 = vld [vmem:[#allocation19 + $0x20] sm:$0xff] }
 0x212   :  { %692 = vmatpush.msra.mxu3 %v687_v55  ;;  %v661_v55 = vld [vmem:[#allocation19 + $0x18] sm:$0xff] }
 0x214   :  { %693 = vmatpush.msra.mxu3 %v686_v56  ;;  %v660_v56 = vld [vmem:[#allocation19 + $0x10] sm:$0xff] }
 0x216   :  { %694 = vmatpush.msra.mxu3 %v685_v57  ;;  %v733_v57 = vld [vmem:[#allocation25 + $0x18] sm:$0xff] }
 0x218   :  { %695 = vmatpush.msra.mxu3 %v684_v58  ;;  %v659_v58 = vld [vmem:[#allocation19 + $0x8] sm:$0xff] }
 0x270   :  { %v450_v16 = vpop.f32.mrf.mxu3 }
 0x271   :  { %v456_v17 = vadd.f32 %v450_v16, %v428_v63  ;;  %v798_v63 = vld [vmem:[#allocation24 + $0x68] sm:$0xff]  ;;  %v673_v16 = vld [vmem:[#allocation19 + $0x78] sm:$0xff] }
 0x273   :  { %494 = vmatmul.f32.vlgmr.msra.gmra.mxu0 %v456_v17  ;;  %v793_v17 = vld [vmem:[#allocation24 + $0x40] sm:$0xff] }
 0x274   :  { %808 = vmatpush.msra.mxu0 %v800_v59  ;;  %v792_v59 = vld [vmem:[#allocation24 + $0x38] sm:$0xff] }
 0x276   :  { %809 = vmatpush.msra.mxu0 %v799_v62  ;;  %v658_v62 = vld [vmem:[#allocation19] sm:$0xff] }
 0x278   :  { %v453_v19 = vpop.f32.mrf.mxu3  ;;  %810 = vmatpush.msra.mxu0 %v798_v63  ;;  %v791_v63 = vld [vmem:[#allocation24 + $0x30] sm:$0xff] }
 0x279   :  { %v457_v20 = vadd.f32 %v453_v19, %v431_v61  ;;  %v683_v61 = vld [vmem:[#allocation21 + $0x48] sm:$0xff]  ;;  %v744_v19 = vld [vmem:[#allocation25 + $0x70] sm:$0xff] }
 0x27a   :  { %696 = vmatpush.msra.mxu3 %v683_v61  ;;  %811 = vmatpush.msra.mxu0 %v797_v1  ;;  %v732_v61 = vld [vmem:[#allocation25 + $0x10] sm:$0xff]  ;;  %v731_v1 = vld [vmem:[#allocation25 + $0x8] sm:$0xff] }
 0x27b   :  { %497 = vmatmul.f32.gmra.mxu0 %v457_v20  ;;  %v672_v20 = vld [vmem:[#allocation19 + $0x70] sm:$0xff] }
 0x27c   :  { %697 = vmatpush.msra.mxu3 %v682_v0  ;;  %812 = vmatpush.msra.mxu0 %v796_v4  ;;  %v774_v0 = vld [vmem:[#allocation22 + $0x28] sm:$0xff] }
 0x27e   :  { %698 = vmatpush.msra.mxu3 %v681_v3  ;;  %813 = vmatpush.msra.mxu0 %v795_v7  ;;  %v637_v3 = vld [vmem:[%s1630_s16] sm:$0x1] }
 0x280   :  { %699 = vmatpush.msra.mxu3 %v680_v5  ;;  %814 = vmatpush.msra.mxu0 %v794_v11  ;;  %v790_v5 = vld [vmem:[#allocation24 + $0x28] sm:$0xff]  ;;  %v788_v11 = vld [vmem:[#allocation24 + $0x18] sm:$0xff] }
 0x282   :  { %700 = vmatpush.msra.mxu3 %v679_v2  ;;  %815 = vmatpush.msra.mxu0 %v793_v17  ;;  %v772_v2 = vld [vmem:[#allocation22 + $0x18] sm:$0xff] }
 0x283   :  { %654 = vmatmul.f32.vlgmr.msrb.gmra.mxu0 %v620_v52  ;;  %v776_v52 = vld [vmem:[#allocation22 + $0x38] sm:$0xff] }
 0x284   :  { %701 = vmatpush.msra.mxu3 %v678_v14  ;;  %816 = vmatpush.msra.mxu0 %v792_v59  ;;  %v786_v14 = vld [vmem:[#allocation24 + $0x8] sm:$0xff] }
 0x286   :  { %702 = vmatpush.msra.mxu3 %v677_v18  ;;  %817 = vmatpush.msra.mxu0 %v791_v63 }
 0x288   :  { %703 = vmatpush.msra.mxu3 %v676_v21  ;;  %818 = vmatpush.msra.mxu0 %v790_v5 }
 0x28a   :  { %704 = vmatpush.msra.mxu3 %v675_v24 }
 0x2f0   :  { %v495_v29 = vpop.f32.mrf.mxu0 }
 0x2f1   :  { %v496_v30 = vadd.f32 %v936_v28, %v495_v29  ;;  %v741_v29 = vld [vmem:[#allocation25 + $0x58] sm:$0xff] }
 0x2f3   :  { %v501_v31 = vmax.f32 %v496_v30, 0.0  ;;  %v784_v30 = vld [vmem:[#allocation22 + $0x78] sm:$0xff] }
 0x2f5   :  { %539 = vmatmul.f32.vlgmr.msrb.gmra.mxu3 %v501_v31  ;;  %v670_v31 = vld [vmem:[#allocation19 + $0x60] sm:$0xff] }
 0x2f8   :  { %v498_v32 = vpop.f32.mrf.mxu0 }
 0x2f9   :  { %v499_v33 = vadd.f32 %v936_v28, %v498_v32  ;;  %v674_v28 = vld [vmem:[#allocation21] sm:$0xff]  ;;  %v740_v32 = vld [vmem:[#allocation25 + $0x50] sm:$0xff] }
 0x2fa   :  { %705 = vmatpush.msra.mxu3 %v674_v28 }
 0x2fb   :  { %v502_v34 = vmax.f32 %v499_v33, 0.0  ;;  %v783_v33 = vld [vmem:[#allocation22 + $0x70] sm:$0xff] }
 0x2fc   :  { %834 = vmatpush.msrb.mxu3 %v784_v30 }
 0x2fd   :  { %542 = vmatmul.f32.gmra.mxu3 %v502_v34  ;;  %v669_v34 = vld [vmem:[#allocation19 + $0x58] sm:$0xff] }
 0x2fe   :  { %835 = vmatpush.msrb.mxu3 %v783_v33 }
 0x300   :  { %836 = vmatpush.msrb.mxu3 %v782_v36  ;;  %v655_v4 = vpop.f32.mrf.mxu0 }
 0x301   :  { %v656_v7 = vadd.f32 %v655_v4, %v637_v3 }
 0x302   :  { %837 = vmatpush.msrb.mxu3 %v781_v39 }
 0x304   :  { %838 = vmatpush.msrb.mxu3 %v780_v42 }
 0x306   :  { %839 = vmatpush.msrb.mxu3 %v779_v45 }
 0x308   :  { %840 = vmatpush.msrb.mxu3 %v778_v48 }
 0x30a   :  { %841 = vmatpush.msrb.mxu3 %v777_v51 }
 0x30c   :  { %842 = vmatpush.msrb.mxu3 %v776_v52 }
 0x378   :  { %v540_v60 = vpop.f32.mrf.mxu3 }
 0x379   :  { %v541_v12 = vadd.f32 %v937_v6, %v540_v60  ;;  %v775_v60 = vld [vmem:[#allocation22 + $0x30] sm:$0xff] }
 0x37a   :  { %843 = vmatpush.msrb.mxu3 %v775_v60 }
 0x37c   :  { %844 = vmatpush.msrb.mxu3 %v774_v0 }
 0x380   :  { %v543_v9 = vpop.f32.mrf.mxu3 }
 0x381   :  { %v544_v10 = vadd.f32 %v937_v6, %v543_v9  ;;  %v773_v6 = vld [vmem:[#allocation22 + $0x20] sm:$0xff] }
 0x382   :  { %845 = vmatpush.msrb.mxu3 %v773_v6  ;;  %v730_v9 = vld [vmem:[#allocation25] sm:$0xff] }
 0x383   :  { %568 = vmatpush.msrb.mxu1 %v544_v10  ;;  %599 = vmatpush.msra.mxu2 %v544_v10  ;;  %v789_v10 = vld [vmem:[#allocation24 + $0x20] sm:$0xff] }
 0x384   :  { %819 = vmatpush.msra.mxu0 %v789_v10  ;;  %846 = vmatpush.msrb.mxu3 %v772_v2 }
 0x385   :  { %569 = vmatpush.msrb.mxu1 %v541_v12  ;;  %600 = vmatpush.msra.mxu2 %v541_v12  ;;  %v771_v12 = vld [vmem:[#allocation22 + $0x10] sm:$0xff] }
 0x386   :  { %913 = vmatmul.msk.f32.vlgmr.msra.gmra.mxu2 %vm313_vm0, %v577_v8  ;;  %911 = vmatmul.msk.f32.vlgmr.msrb.gmra.mxu1 %vm313_vm0, %v546_v13  ;;  %v787_v8 = vld [vmem:[#allocation24 + $0x10] sm:$0xff]  ;;  %v770_v13 = vld [vmem:[#allocation22 + $0x8] sm:$0xff] }
 0x387   :  { %746 = vmatpush.msrb.mxu2 %v745_v15  ;;  %710 = vmatpush.msra.mxu1 %v673_v16  ;;  %v769_v15 = vld [vmem:[#allocation22] sm:$0xff] }
 0x388   :  { %820 = vmatpush.msra.mxu0 %v788_v11  ;;  %847 = vmatpush.msrb.mxu3 %v771_v12  ;;  %v785_v16 = vld [vmem:[#allocation24] sm:$0xff] }
 0x389   :  { %747 = vmatpush.msrb.mxu2 %v744_v19  ;;  %711 = vmatpush.msra.mxu1 %v672_v20 }
 0x38a   :  { %821 = vmatpush.msra.mxu0 %v787_v8  ;;  %848 = vmatpush.msrb.mxu3 %v770_v13 }
 0x38b   :  { %748 = vmatpush.msrb.mxu2 %v743_v22  ;;  %712 = vmatpush.msra.mxu1 %v671_v23 }
 0x38c   :  { %822 = vmatpush.msra.mxu0 %v786_v14  ;;  %849 = vmatpush.msrb.mxu3 %v769_v15 }
 0x38d   :  { %749 = vmatpush.msrb.mxu2 %v742_v25  ;;  %713 = vmatpush.msra.mxu1 %v670_v31 }
 0x38e   :  { %914 = vmatmul.msk.f32.gmra.mxu2 %vm313_vm0, %v578_v26  ;;  %912 = vmatmul.msk.f32.gmra.mxu1 %vm313_vm0, %v547_v27 }
 0x38f   :  { %750 = vmatpush.msrb.mxu2 %v741_v29  ;;  %714 = vmatpush.msra.mxu1 %v669_v34 }
 0x390   :  { %823 = vmatpush.msra.mxu0 %v785_v16 }
 0x391   :  { %751 = vmatpush.msrb.mxu2 %v740_v32  ;;  %715 = vmatpush.msra.mxu1 %v668_v37 }
 0x393   :  { %752 = vmatpush.msrb.mxu2 %v739_v35  ;;  %716 = vmatpush.msra.mxu1 %v667_v40 }
 0x395   :  { %753 = vmatpush.msrb.mxu2 %v738_v38  ;;  %717 = vmatpush.msra.mxu1 %v666_v43  ;;  %v767_v38 = vld [vmem:[%s1636_s22] sm:$0x1]  ;;  %s889_s22 = sshll.u32 %s1638_s24, 4  ;;  %s890_s22 = int_to_ptr.hbm [resolvable:$true] %s889_s22 }
 0x397   :  { %754 = vmatpush.msrb.mxu2 %v737_v41  ;;  %718 = vmatpush.msra.mxu1 %v665_v46  ;;  %v857_v46 = vld [vmem:[%s1637_s23] sm:$0x1] }
 0x399   :  { %755 = vmatpush.msrb.mxu2 %v736_v44  ;;  %719 = vmatpush.msra.mxu1 %v664_v49 }
 0x39b   :  { %756 = vmatpush.msrb.mxu2 %v735_v47  ;;  %720 = vmatpush.msra.mxu1 %v663_v53  ;;  %v859_v47 = vstv %s915_s18 }
 0x39d   :  { %757 = vmatpush.msrb.mxu2 %v734_v50  ;;  %721 = vmatpush.msra.mxu1 %v662_v54 }
 0x39f   :  { %722 = vmatpush.msra.mxu1 %v661_v55  ;;  %758 = vmatpush.msrb.mxu2 %v733_v57 }
 0x3a1   :  { %723 = vmatpush.msra.mxu1 %v660_v56  ;;  %759 = vmatpush.msrb.mxu2 %v732_v61 }
 0x3a3   :  { %724 = vmatpush.msra.mxu1 %v659_v58  ;;  %760 = vmatpush.msrb.mxu2 %v731_v1 }
 0x3a5   :  { %725 = vmatpush.msra.mxu1 %v658_v62  ;;  %761 = vmatpush.msrb.mxu2 %v730_v9 }
 0x3a6   :  { %762 = vmatmul.f32.vlgmr.msrb.gmra.mxu2 %v656_v7 }
 0x403   :  { %v571_v17 = vpop.f32.mrf.mxu1 }
 0x409   :  { %v602_v18 = vpop.f32.mrf.mxu2 }
 0x40a   :  { %v608_v19 = vadd.f32 %v602_v18, %v571_v17  ;;  %v610_v20 = vsub.f32 %v571_v17, %v602_v18 }
 0x40b   :  { %v574_v22 = vpop.f32.mrf.mxu1 }
 0x40c   :  { %v612_v21 = vand.u32 2147483647, %v610_v20  ;;  %726 = vmatmul.f32.vlgmr.msra.gmra.mxu1 %v608_v19  ;;  %v830_v26 = vrot.slane %v608_v19, 1 }
 0x40e   :  { %706 = vmatmul.f32.vlgmr.msra.gmra.mxu3 %v612_v21  ;;  %v804_v29 = vrot.slane %v612_v21, 1 }
 0x411   :  { %v605_v23 = vpop.f32.mrf.mxu2 }
 0x412   :  { %v609_v24 = vadd.f32 %v605_v23, %v574_v22  ;;  %v611_v25 = vsub.f32 %v574_v22, %v605_v23 }
 0x414   :  { %v613_v27 = vand.u32 2147483647, %v611_v25  ;;  %v831_v28 = vrot.slane %v609_v24, 1 }
 0x416   :  { %v805_v30 = vrot.slane %v613_v27, 1  ;;  %v832_v31 = vsel %vm803_vm1, %v830_v26, %v831_v28 }
 0x417   :  { %850 = vmatmul.f32.vlgmr.msrb.gmra.mxu3 %v832_v31 }
 0x418   :  { %v806_v32 = vsel %vm803_vm1, %v804_v29, %v805_v30 }
 0x419   :  { %824 = vmatmul.f32.vlgmr.msra.gmra.mxu0 %v806_v32 }
 0x429   :  { %v763_v33 = vpop.f32.mrf.mxu2 }
 0x489   :  { %v727_v35 = vpop.f32.mrf.mxu1 }
 0x491   :  { %v707_v34 = vpop.f32.mrf.mxu3 }
 0x492   :  { %v728_v36 = vadd.f32 %v727_v35, %v707_v34 }
 0x494   :  { %v766_v37 = vadd.f32 %v763_v33, %v728_v36 }
 0x496   :  { %v768_v39 = vadd.f32 %v767_v38, %v766_v37  ;;  %v825_v40 = vpop.f32.mrf.mxu0 }
 0x498   :  { %v854_v42 = vperm.slane %v768_v39, 0 }
 0x49a   :  { %v851_v41 = vpop.f32.mrf.mxu3 }
 0x49b   :  { %v852_v43 = vadd.f32 %v851_v41, %v825_v40 }
 0x49d   :  { %v855_v44 = vadd.f32 %v854_v42, %v852_v43 }
 0x49f   :  { %v856_v45 = vmax.f32 %v855_v44, 0.0 }
 0x4a1   :  { %875 = vmatpush.xpose.msrb.mxu1 %v856_v45 }
 0x4a4   :  { %876 = vmatmul.f32.vlgmr.msrb.gmra.mxu1 %v857_v46 }
 0x521   :  { %v877_v48 = vpop.f32.mrf.mxu1 }
 0x522   :  { %v878_v49 = vadd.f32 %v877_v48, %v859_v47 }
 0x524   :  { %881 = vst.msk [vmem:[#allocation27] sm:$0x1] %vm880_vm2, %v878_v49 }
 0x525   :  { %892 = dma.vmem_to_hbm [thread:$0]  %s888_s8, 16, %s890_s22, [#allocation4]  }
 0x526   :  { %1328 = dma.done.wait [#allocation4], 16  }
 0x527   :  { %1329 = vsyncadd [#allocation4], 4294967280 }
 0x528   :  { %897 = vsyncpa [#allocation3], 1 }
 0x529   :  { %898 = vsyncpa [#allocation8], 1 }
 0x52a   :  { %899 = vsyncpa [#allocation11], 1 }
 0x52b   :  { %900 = vsyncpa [#allocation14], 1 }
 0x52c   :  { %901 = vsyncpa [#allocation17], 1 }
 0x52d   :  { %902 = vsyncpa [#allocation20], 1 }
 0x52e   :  { %903 = vsyncpa [#allocation23], 1 }
 0x52f   :  { %904 = vsyncpa [#allocation26], 1 }
 0x530   :  { %905 = vsyncpa [#allocation4], 1 }
 0x531   :  { %906 = vsyncpa [#allocation5], 1 }

</bundles_post_ra>
